<compile_context>
chip_gen: v5e
topology: v5e:2x2
jax: 0.10.0
libtpu: 0.0.40
codegen_flags: <defaults>
</compile_context>

<pallas_src>
import math

import jax
import jax.numpy as jnp
from jax.experimental import pallas as pl
from jax.experimental.pallas import tpu as pltpu

LANE = 128


def _round_up(x, m):
    return ((x + m - 1) // m) * m


def arc_biaffine_kernel(dep_ref, headT_ref, u_ref, bias_ref, out_ref, tmp_ref):
    # dep_ref:   [1, TI, H]  row tile of dep for batch b          (compute dtype)
    # headT_ref: [1, H, TJ]  column tile of head^T for batch b    (compute dtype)
    # u_ref:     [H, H]      resident                             (compute dtype)
    # bias_ref:  [1, H]      resident                             (f32)
    # out_ref:   [1, TI, TJ]
    # tmp_ref:   [TI, H]     VMEM scratch: dep_tile @ U + bias    (compute dtype)

    # The projection depends only on the row tile: compute once per (b, i) at
    # the first column step and reuse for every J tile (J innermost).
    @pl.when(pl.program_id(2) == 0)
    def _():
        proj = jnp.dot(dep_ref[0], u_ref[...],
                       preferred_element_type=jnp.float32)          # [TI, H] f32
        proj = proj + bias_ref[...]                                  # bias folded in
        tmp_ref[...] = proj.astype(tmp_ref.dtype)

    # Plain [TI, H] @ [H, TJ] MXU matmul (head pre-transposed in the wrapper),
    # f32 accumulation.
    scores = jnp.dot(tmp_ref[...], headT_ref[0],
                     preferred_element_type=jnp.float32)             # [TI, TJ]
    out_ref[0] = scores.astype(out_ref.dtype)


def arc_biaffine(dep, head, U, bias=None, *, tile_i=512, tile_j=256,
                 compute_dtype=jnp.bfloat16, out_dtype=None):
    """dep, head: [B, L, H]; U: [H, H]; bias: [H] or None. Returns [B, L, L].

    compute_dtype: dtype of the matmul inputs (bf16 recommended on TPU; the
                   accumulation stays f32). out_dtype defaults to dep.dtype
                   (note: bf16 output downcasts an f32 accumulation).
    """
    B, L, H = dep.shape
    if out_dtype is None:
        out_dtype = dep.dtype

    if bias is None:
        bias = jnp.zeros((H,), dtype=jnp.float32)

    dep_c = dep.astype(compute_dtype)
    head_c = head.astype(compute_dtype)
    U_c = U.astype(compute_dtype)
    bias2d = bias.reshape(1, H).astype(jnp.float32)   # added post-accumulation

    # ---- Tile selection: lane-dense 128-multiples, asymmetric TI / TJ. ----
    Lp128 = _round_up(L, LANE)
    ti = max(LANE, min(_round_up(tile_i, LANE), Lp128))
    tj = max(LANE, min(_round_up(tile_j, LANE), Lp128))
    # v7x shards the "parallel" grid axes over 2 TensorCores; keep the parallel
    # extent B * n_row_tiles >= 2 when the shape allows it.
    if B * (_round_up(Lp128, ti) // ti) < 2 and Lp128 >= 2 * LANE:
        ti = max(LANE, ((Lp128 // 2) // LANE) * LANE)

    Lp_i = _round_up(L, ti)   # padded row extent (multiple of ti)
    Lp_j = _round_up(L, tj)   # padded col extent (multiple of tj)
    n_i = Lp_i // ti
    n_j = Lp_j // tj

    dep_p = dep_c if Lp_i == L else jnp.pad(dep_c, ((0, 0), (0, Lp_i - L), (0, 0)))
    head_p = head_c if Lp_j == L else jnp.pad(head_c, ((0, 0), (0, Lp_j - L), (0, 0)))
    # One-time wrapper transpose so the kernel runs a plain [TI,H] x [H,TJ] dot
    # (no per-step transpose of the head tile inside the kernel).
    headT = jnp.swapaxes(head_p, 1, 2)                 # [B, H, Lp_j]

    grid_spec = pltpu.PrefetchScalarGridSpec(
        num_scalar_prefetch=0,
        grid=(B, n_i, n_j),
        in_specs=[
            pl.BlockSpec((1, ti, H), lambda b, i, j: (b, i, 0)),   # dep row tile
            pl.BlockSpec((1, H, tj), lambda b, i, j: (b, 0, j)),   # head^T col tile
            pl.BlockSpec((H, H), lambda b, i, j: (0, 0)),          # U (resident)
            pl.BlockSpec((1, H), lambda b, i, j: (0, 0)),          # bias (resident)
        ],
        out_specs=pl.BlockSpec((1, ti, tj), lambda b, i, j: (b, i, j)),
        scratch_shapes=[pltpu.VMEM((ti, H), compute_dtype)],
    )

    cbytes = jnp.dtype(compute_dtype).itemsize
    obytes = jnp.dtype(out_dtype).itemsize

    # Double-buffered VMEM working set -> explicit limit (default scoped limit
    # is 16 MiB on v5e / 32 MiB on v6e & v7x). Capped at 64 MiB for v7x safety.
    working = (2 * ti * H * cbytes            # dep tile x2
               + 2 * H * tj * cbytes          # head^T tile x2
               + 2 * H * H * cbytes           # U x2
               + 2 * H * 4                    # bias x2
               + 2 * ti * tj * obytes         # out tile x2
               + ti * H * cbytes)             # projection scratch
    vmem_limit = int(min(max(2 * working, 32 * 1024 * 1024), 64 * 1024 * 1024))

    flops = 2.0 * B * Lp_i * Lp_j * H + 2.0 * B * Lp_i * H * H
    bytes_accessed = (
        B * Lp_i * H * cbytes                 # dep (read once per row tile)
        + B * n_i * Lp_j * H * cbytes         # head^T re-read once per row pass
        + H * H * cbytes + H * 4              # U + bias (resident)
        + B * Lp_i * Lp_j * obytes)           # output write

    out = pl.pallas_call(
        arc_biaffine_kernel,
        out_shape=jax.ShapeDtypeStruct((B, Lp_i, Lp_j), out_dtype),
        grid_spec=grid_spec,
        compiler_params=pltpu.CompilerParams(
            # J reuses the projection scratch computed at j == 0 -> "arbitrary".
            dimension_semantics=("parallel", "parallel", "arbitrary"),
            vmem_limit_bytes=vmem_limit),
        cost_estimate=pl.CostEstimate(
            flops=int(flops), transcendentals=0,
            bytes_accessed=int(bytes_accessed)),
    )(dep_p, headT, U_c, bias2d)

    # Padded dep rows carry bias . head[j] (nonzero) before this slice-back;
    # keep the slice whenever the padding logic changes.
    if Lp_i != L or Lp_j != L:
        out = out[:, :L, :L]
    return out


def arc_biaffine_ref(dep, head, U, bias):
    out = jnp.einsum("bih,hk,bjk->bij", dep, U, head)
    out = out + jnp.einsum("bjh,h->bj", head, bias)[:, None, :]
    return out


def arc_biaffine_ref_lowp(dep, head, U, bias, compute_dtype):
    # Mimics the kernel's mixed precision: low-precision matmul inputs,
    # f32 accumulation, bias added in f32, projection recast before 2nd matmul.
    f32 = jnp.float32
    dep_c = dep.astype(compute_dtype).astype(f32)
    head_c = head.astype(compute_dtype).astype(f32)
    U_c = U.astype(compute_dtype).astype(f32)
    proj = jnp.einsum("bih,hk->bik", dep_c, U_c) + bias.astype(f32)[None, None, :]
    proj = proj.astype(compute_dtype).astype(f32)
    return jnp.einsum("bih,bjh->bij", proj, head_c)


if __name__ == "__main__":
    key = jax.random.PRNGKey(0)

    # --- Test 1: small shapes matching the module spec (batch=2, seq=8, hidden=32),
    #             f32 compute mode, NONZERO bias, exact reference comparison. ---
    B, L, H = 2, 8, 32
    k_dep, k_head, k_u, k_b = jax.random.split(key, 4)
    dep = jax.random.normal(k_dep, (B, L, H), dtype=jnp.float32)
    head = jax.random.normal(k_head, (B, L, H), dtype=jnp.float32)
    a = math.sqrt(6.0 / (H + H))  # xavier_uniform_ bound for [H, H]
    U = jax.random.uniform(k_u, (H, H), minval=-a, maxval=a, dtype=jnp.float32)
    bias = jax.random.normal(k_b, (H,), dtype=jnp.float32)

    out = jax.block_until_ready(
        arc_biaffine(dep, head, U, bias, compute_dtype=jnp.float32))
    ref = arc_biaffine_ref(dep, head, U, bias)
    assert out.shape == (B, L, L)
    assert jnp.allclose(out, ref, atol=1e-4, rtol=1e-4), "mismatch vs reference (f32)"

    # --- Test 2: bf16 compute (default) on the tiled path: multiple asymmetric
    #             row/col tiles, scratch reuse across J, L not a multiple of the
    #             tile -> padding + slice-back. ---
    B2, L2, H2 = 2, 300, 64
    k_dep2, k_head2, k_u2, k_b2 = jax.random.split(jax.random.PRNGKey(1), 4)
    dep2 = jax.random.normal(k_dep2, (B2, L2, H2), dtype=jnp.float32)
    head2 = jax.random.normal(k_head2, (B2, L2, H2), dtype=jnp.float32)
    a2 = math.sqrt(6.0 / (H2 + H2))
    U2 = jax.random.uniform(k_u2, (H2, H2), minval=-a2, maxval=a2, dtype=jnp.float32)
    bias2 = jax.random.normal(k_b2, (H2,), dtype=jnp.float32)

    out2 = jax.block_until_ready(
        arc_biaffine(dep2, head2, U2, bias2, tile_i=256, tile_j=128))
    ref2 = arc_biaffine_ref_lowp(dep2, head2, U2, bias2, jnp.bfloat16)
    assert out2.shape == (B2, L2, L2)
    assert jnp.allclose(out2, ref2, atol=1e-1, rtol=2e-2), "mismatch vs reference (bf16 tiled)"

    print("KERNEL_OK")
</pallas_src>

<mosaic_0001>
module attributes {stable_mosaic.version = 11 : i64} {
  func.func @arc_biaffine_kernel(%arg0: i32, %arg1: i32, %arg2: i32, %arg3: memref<1x128x32xf32, #tpu.memory_space<vmem>>, %arg4: memref<1x32x128xf32, #tpu.memory_space<vmem>>, %arg5: memref<32x32xf32, #tpu.memory_space<vmem>>, %arg6: memref<1x32xf32, #tpu.memory_space<vmem>>, %arg7: memref<1x128x128xf32, #tpu.memory_space<vmem>>, %arg8: memref<128x32xf32, #tpu.memory_space<vmem>>) attributes {dimension_semantics = [#tpu.dimension_semantics<parallel>, #tpu.dimension_semantics<parallel>, #tpu.dimension_semantics<arbitrary>], iteration_bounds = array<i64: 2, 1, 1>, scalar_prefetch = 0 : i64, scratch_operands = 1 : i64, tpu.core_type = #tpu.core_type<tc>, window_params = [{transform_indices = @transform_0, window_bounds = array<i64: 1, 128, 32>}, {transform_indices = @transform_1, window_bounds = array<i64: 1, 32, 128>}, {pipeline_mode = #tpu.pipeline_mode<synchronous>, transform_indices = @transform_2, window_bounds = array<i64: 32, 32>}, {pipeline_mode = #tpu.pipeline_mode<synchronous>, transform_indices = @transform_3, window_bounds = array<i64: 1, 32>}, {transform_indices = @transform_4, window_bounds = array<i64: 1, 128, 128>}]} {
    %c0_i32 = arith.constant 0 : i32
    %0 = arith.cmpi eq, %arg2, %c0_i32 : i32
    %1 = arith.extui %0 : i1 to i32
    %c0_i32_0 = arith.constant 0 : i32
    %2 = arith.cmpi ne, %1, %c0_i32_0 : i32
    scf.if %2 {
      %c0_8 = arith.constant 0 : index
      %c0_9 = arith.constant 0 : index
      %c0_10 = arith.constant 0 : index
      %10 = vector.load %arg3[%c0_8, %c0_9, %c0_10] : memref<1x128x32xf32, #tpu.memory_space<vmem>>, vector<1x128x32xf32>
      %11 = vector.shape_cast %10 : vector<1x128x32xf32> to vector<128x32xf32>
      %c0_11 = arith.constant 0 : index
      %c0_12 = arith.constant 0 : index
      %12 = vector.load %arg5[%c0_11, %c0_12] : memref<32x32xf32, #tpu.memory_space<vmem>>, vector<32x32xf32>
      %cst_13 = arith.constant dense<0.000000e+00> : vector<128x32xf32>
      %13 = tpu.matmul %11, %12, %cst_13 {dimension_numbers = #tpu.dot_dimension_numbers<[1], [0], [0], [1], [0, 0, 1, 1], [], []>} : vector<128x32xf32>, vector<32x32xf32>, vector<128x32xf32> -> vector<128x32xf32>
      %c0_14 = arith.constant 0 : index
      %c0_15 = arith.constant 0 : index
      %14 = vector.load %arg6[%c0_14, %c0_15] : memref<1x32xf32, #tpu.memory_space<vmem>>, vector<1x32xf32>
      %15 = vector.broadcast %14 : vector<1x32xf32> to vector<128x32xf32>
      %16 = arith.addf %13, %15 : vector<128x32xf32>
      %c0_16 = arith.constant 0 : index
      %c0_17 = arith.constant 0 : index
      %17 = vector.load %arg8[%c0_16, %c0_17] : memref<128x32xf32, #tpu.memory_space<vmem>>, vector<128x32xf32>
      tpu.vector_store %arg8[%c0_16, %c0_17], %16 {strides = array<i32>} : memref<128x32xf32, #tpu.memory_space<vmem>>, vector<128x32xf32>,
    } else {
    }
    %c0 = arith.constant 0 : index
    %c0_1 = arith.constant 0 : index
    %3 = vector.load %arg8[%c0, %c0_1] : memref<128x32xf32, #tpu.memory_space<vmem>>, vector<128x32xf32>
    %c0_2 = arith.constant 0 : index
    %c0_3 = arith.constant 0 : index
    %c0_4 = arith.constant 0 : index
    %4 = vector.load %arg4[%c0_2, %c0_3, %c0_4] : memref<1x32x128xf32, #tpu.memory_space<vmem>>, vector<1x32x128xf32>
    %5 = vector.shape_cast %4 : vector<1x32x128xf32> to vector<32x128xf32>
    %cst = arith.constant dense<0.000000e+00> : vector<128x128xf32>
    %6 = tpu.matmul %3, %5, %cst {dimension_numbers = #tpu.dot_dimension_numbers<[1], [0], [0], [1], [0, 0, 1, 1], [], []>} : vector<128x32xf32>, vector<32x128xf32>, vector<128x128xf32> -> vector<128x128xf32>
    %c0_5 = arith.constant 0 : index
    %c0_6 = arith.constant 0 : index
    %c0_7 = arith.constant 0 : index
    %7 = vector.load %arg7[%c0_5, %c0_6, %c0_7] : memref<1x128x128xf32, #tpu.memory_space<vmem>>, vector<1x128x128xf32>
    %8 = vector.shape_cast %7 : vector<1x128x128xf32> to vector<128x128xf32>
    %9 = vector.shape_cast %6 : vector<128x128xf32> to vector<1x128x128xf32>
    tpu.vector_store %arg7[%c0_5, %c0_6, %c0_7], %9 {strides = array<i32>} : memref<1x128x128xf32, #tpu.memory_space<vmem>>, vector<1x128x128xf32>,
    return
  }
  func.func @transform_0(%arg0: i32, %arg1: i32, %arg2: i32) -> (i32, i32, i32) {
    %c0_i32 = arith.constant 0 : i32
    %c0_i32_0 = arith.constant 0 : i32
    return %arg0, %arg1, %c0_i32 : i32, i32, i32
  }
  func.func @transform_1(%arg0: i32, %arg1: i32, %arg2: i32) -> (i32, i32, i32) {
    %c0_i32 = arith.constant 0 : i32
    %c0_i32_0 = arith.constant 0 : i32
    return %arg0, %c0_i32, %arg2 : i32, i32, i32
  }
  func.func @transform_2(%arg0: i32, %arg1: i32, %arg2: i32) -> (i32, i32) {
    %c0_i32 = arith.constant 0 : i32
    %c0_i32_0 = arith.constant 0 : i32
    %c0_i32_1 = arith.constant 0 : i32
    return %c0_i32, %c0_i32_0 : i32, i32
  }
  func.func @transform_3(%arg0: i32, %arg1: i32, %arg2: i32) -> (i32, i32) {
    %c0_i32 = arith.constant 0 : i32
    %c0_i32_0 = arith.constant 0 : i32
    %c0_i32_1 = arith.constant 0 : i32
    return %c0_i32, %c0_i32_0 : i32, i32
  }
  func.func @transform_4(%arg0: i32, %arg1: i32, %arg2: i32) -> (i32, i32, i32) {
    %c0_i32 = arith.constant 0 : i32
    return %arg0, %arg1, %arg2 : i32, i32, i32
  }
}

</mosaic_0001>

<bundles_post_ra>
// kernel: tpu_custom_call.1
= control target key start
LH: loop header
LB: loop body
LE: loop exit
PB: predicated region body
PF: predicated region fallthrough
CT: control target
= control target key end

     0   :  { %9 = vsyncpa [#allocation4], 0  ;;  %s1144_s0 = inlined_call_operand.vmem [shape: f32[2,128,32], index: 0, kind: input, shape index: {}]   ;;  %s1145_s1 = inlined_call_operand.vmem [shape: f32[2,32,128], index: 1, kind: input, shape index: {}]   ;;  %s1146_s2 = inlined_call_operand.vmem [shape: f32[32,32], index: 2, kind: input, shape index: {}]   ;;  %s1147_s3 = inlined_call_operand.vmem [shape: f32[1,32], index: 3, kind: input, shape index: {}]   ;;  %s1148_s4 = inlined_call_operand.hbm [shape: f32[2,128,128], index: 4, kind: output, shape index: {}]  }
   0x1   :  { %11 = vsyncpa [#allocation4 + $0x1], 0  ;;  %s918_s15 = smov 0   ;;  %s920_s16 = smov 0  }
   0x2   :  { %s922_s17 = smov 0   ;;  %s924_s18 = smov 0  }
   0x3   :  { %s926_s19 = smov 0   ;;  %s928_s20 = smov 0  }
   0x4 LB: > { %s695_s21 = sadd.s32 4294967295, %s889_s20   ;;  %s696_s22 = sadd.s32 4294967294, %s889_s20   ;;  %s889_s20 = sphi %s928_s20, %s17_s20   ;;  %s885_s19 = sphi %s926_s19, %s1155_s19   ;;  %s881_s18 = sphi %s924_s18, %s1154_s18   ;;  %s877_s17 = sphi %s922_s17, %s1153_s17   ;;  %s873_s16 = sphi %s920_s16, %s1152_s16   ;;  %s869_s15 = sphi %s918_s15, %s1151_s15  }
   0x5   : > { %s36_s23 = sadd.s32 1, %s885_s19  ;;  %s145_s24 = sadd.s32 1, %s877_s17 }
   0x6   : > { %p38_p0 = scmp.ge.s32.totalorder %s36_s23, 2  ;;  %p155_p1 = scmp.ne.s32.totalorder %s877_s17, %s873_s16 }
   0x7   : > { %p156_p2 = scmp.eq.s32.totalorder %s695_s21, 1  ;;  %p161_p3 = scmp.ne.s32.totalorder %s873_s16, %s869_s15 }
   0x8   : > { %s1157_s23 = smov (%p38_p0, %s36_s23), 0  ;;  %p162_p5 = scmp.eq.s32.totalorder %s696_s22, 1 }
   0x9   : > { %p958_p4 = por %p156_p2, %p155_p1  ;;  %s138_s26 = ssub.s32 %s885_s19, %s1157_s23 }
   0xa   : > { %p699_p6 = scmp.ge.s32.totalorder %s889_s20, 1  ;;  %p143_p7 = scmp.eq.s32.totalorder %s138_s26, 0 }
   0xb   : > { %p965_p8 = por %p162_p5, %p161_p3  ;;  %p210_p9 = scmp.lt.s32.totalorder %s889_s20, 3 }
   0xc   : > { %s971_s28 = scalar_select %p143_p7, %s877_s17, %s145_s24  }
   0xd   : > { %p211_p10 = pnand %p699_p6, %p210_p9 }
   0xe   : > { %p249_p11 = scmp.lt.s32.totalorder (!%p211_p10), %s881_s18, 1  ;;  %s245_s6 = sand.u32 (!%p211_p10), 1, %s873_s16  }
   0xf   : > { %214 = sbr.rel (%p211_p10) target bundleno = 362 (0x16a), region = 36  ;;  %s700_s7 = sshll.u32 (!%p211_p10), %s245_s6, 7 }
  0x10   : > { %s1087_s8 = scalar_lea.vmem (!%p211_p10), [#allocation3], %s700_s7 }
  0x11   : > { %s591_s13 = sshll.u32 (!%p211_p10), %s1087_s8, 4  ;;  %s592_s13 = int_to_ptr.vmem [resolvable:$true] %s591_s13 }
  0x14   : > { %v290_v0 = vld [vmem:[%s1146_s2 + $0x18] sm:$0xff]  ;;  %v289_v1 = vld [vmem:[%s1146_s2 + $0x10] sm:$0xff]  ;;  %v288_v2 = vld [vmem:[%s1146_s2 + $0x8] sm:$0xff]  ;;  %s984_s9 = scalar_select %p249_p11, %s881_s18, 1  ;;  %vm295_vm0 = vcmask 261120  }
  0x15   : > { %745 = vmatpush.msra.mxu2 %v290_v0  ;;  %356 = vmatpush.msra.mxu0 %v290_v0  ;;  %v287_v3 = vld [vmem:[%s1146_s2] sm:$0xff] }
  0x16   : > { %s742_s12 = sshll.u32 %s984_s9, 7  ;;  %s743_s22 = sshll.u32 %s984_s9, 5  ;;  %v1034_v24 = vld [vmem:[%s1147_s3] ss:$0 sm:$0xff] }
  0x17   : > { %746 = vmatpush.msra.mxu2 %v289_v1  ;;  %357 = vmatpush.msra.mxu0 %v289_v1  ;;  %s993_s21 = scalar_lea.vmem %s1144_s0, %s742_s12  ;;  %s265_s29 = scalar_lea.vmem %s1145_s1, %s743_s22 }
  0x18   : > { %v279_v4 = vld [vmem:[%s993_s21 + $0x40] sm:$0xff]  ;;  %v280_v6 = vld [vmem:[%s993_s21 + $0x48] sm:$0xff]  ;;  %v281_v8 = vld [vmem:[%s993_s21 + $0x50] sm:$0xff]  ;;  %s744_s9 = sshll.u32 %s881_s18, 7 }
  0x19   : > { %747 = vmatpush.msra.mxu2 %v288_v2  ;;  %358 = vmatpush.msra.mxu0 %v288_v2  ;;  %v271_v5 = vld [vmem:[%s993_s21] sm:$0xff]  ;;  %v272_v7 = vld [vmem:[%s993_s21 + $0x8] sm:$0xff]  ;;  %v273_v9 = vld [vmem:[%s993_s21 + $0x10] sm:$0xff]  ;;  %s590_s12 = scalar_lea.hbm %s1148_s4, %s744_s9 }
  0x1a   : > { %v282_v10 = vld [vmem:[%s993_s21 + $0x58] sm:$0xff]  ;;  %v283_v12 = vld [vmem:[%s993_s21 + $0x60] sm:$0xff]  ;;  %v284_v14 = vld [vmem:[%s993_s21 + $0x68] sm:$0xff]  ;;  %s593_s14 = sshll.u32 %s590_s12, 4  ;;  %s594_s14 = int_to_ptr.hbm [resolvable:$true] %s593_s14 }
  0x1b   : > { %748 = vmatpush.msra.mxu2 %v287_v3  ;;  %359 = vmatpush.msra.mxu0 %v287_v3  ;;  %v274_v11 = vld [vmem:[%s993_s21 + $0x18] sm:$0xff]  ;;  %v275_v13 = vld [vmem:[%s993_s21 + $0x20] sm:$0xff]  ;;  %v276_v15 = vld [vmem:[%s993_s21 + $0x28] sm:$0xff]  ;;  %s825_s22 = sshra.s32 %s594_s14, 4  ;;  %s826_s22 = int_to_ptr.hbm [resolvable:$true] %s825_s22 }
  0x1c   : > { %713 = vmatmul.msk.f32.vlgmr.msra.gmra.mxu2 %vm295_vm0, %v279_v4  ;;  %705 = vmatmul.msk.f32.vlgmr.msra.gmra.mxu0 %vm295_vm0, %v271_v5  ;;  %v285_v16 = vld [vmem:[%s993_s21 + $0x70] sm:$0xff]  ;;  %v286_v18 = vld [vmem:[%s993_s21 + $0x78] sm:$0xff]  ;;  %v442_v22 = vld [vmem:[%s265_s29 + $0x8] sm:$0xff]  ;;  %s827_s24 = scalar_lea.hbm %s826_s22, 128  ;;  %p832_p1 = scmp.lt.s32.totalorder %s826_s22, %s1148_s4 }
  0x1d   : > { %v277_v17 = vld [vmem:[%s993_s21 + $0x30] sm:$0xff]  ;;  %v278_v19 = vld [vmem:[%s993_s21 + $0x38] sm:$0xff]  ;;  %v441_v23 = vld [vmem:[%s265_s29] sm:$0xff]  ;;  %s576_s21 = scalar_lea.sflag [#allocation4], %s245_s6  ;;  %p828_p12 = scmp.ne.s32.totalorder %s826_s22, %s827_s24 }
  0x1e   : > { %v444_v20 = vld [vmem:[%s265_s29 + $0x18] sm:$0xff]  ;;  %v443_v21 = vld [vmem:[%s265_s29 + $0x10] sm:$0xff]  ;;  %s831_s29 = scalar_lea.hbm %s1148_s4, 256 }
  0x1f   : > { %749 = vmatpush.msra.mxu3 %v444_v20  ;;  %506 = vmatpush.msra.mxu1 %v444_v20  ;;  %p829_p13 = pnand %p828_p12, %p958_p4  ;;  %p833_p2 = scmp.lt.s32.totalorder %s831_s29, %s827_s24 }
  0x21   : > { %750 = vmatpush.msra.mxu3 %v443_v21  ;;  %507 = vmatpush.msra.mxu1 %v443_v21  ;;  %p830_p0 = pneg %p829_p13  ;;  %p834_p3 = por %p833_p2, %p832_p1 }
  0x23   : > { %751 = vmatpush.msra.mxu3 %v442_v22  ;;  %508 = vmatpush.msra.mxu1 %v442_v22  ;;  %p835_p5 = pnand %p834_p3, %p830_p0 }
  0x24   : > { %714 = vmatmul.msk.f32.gmra.mxu2 %vm295_vm0, %v280_v6  ;;  %706 = vmatmul.msk.f32.gmra.mxu0 %vm295_vm0, %v272_v7 }
  0x25   : > { %752 = vmatpush.msra.mxu3 %v441_v23  ;;  %509 = vmatpush.msra.mxu1 %v441_v23 }
  0x2c   : > { %715 = vmatmul.msk.f32.gmra.mxu2 %vm295_vm0, %v281_v8  ;;  %707 = vmatmul.msk.f32.gmra.mxu0 %vm295_vm0, %v273_v9 }
  0x34   : > { %716 = vmatmul.msk.f32.gmra.mxu2 %vm295_vm0, %v282_v10  ;;  %708 = vmatmul.msk.f32.gmra.mxu0 %vm295_vm0, %v274_v11 }
  0x3c   : > { %717 = vmatmul.msk.f32.gmra.mxu2 %vm295_vm0, %v283_v12  ;;  %709 = vmatmul.msk.f32.gmra.mxu0 %vm295_vm0, %v275_v13 }
  0x44   : > { %718 = vmatmul.msk.f32.gmra.mxu2 %vm295_vm0, %v284_v14  ;;  %710 = vmatmul.msk.f32.gmra.mxu0 %vm295_vm0, %v276_v15 }
  0x4c   : > { %719 = vmatmul.msk.f32.gmra.mxu2 %vm295_vm0, %v285_v16  ;;  %711 = vmatmul.msk.f32.gmra.mxu0 %vm295_vm0, %v277_v17 }
  0x54   : > { %720 = vmatmul.msk.f32.gmra.mxu2 %vm295_vm0, %v286_v18  ;;  %712 = vmatmul.msk.f32.gmra.mxu0 %vm295_vm0, %v278_v19 }
  0x99   : > { %v361_v25 = vpop.f32.mrf.mxu0 }
  0x9a   : > { %v362_v26 = vadd.f32 %v1034_v24, %v361_v25 }
  0x9c   : > { %409 = vst.msk [vmem:[#allocation2] sm:$0xff] %vm295_vm0, %v362_v26 }
  0x9f   : > { %v385_v27 = vpop.f32.mrf.mxu2 }
  0xa0   : > { %v386_v28 = vadd.f32 %v1034_v24, %v385_v27 }
  0xa1   : > { %v364_v29 = vpop.f32.mrf.mxu0 }
  0xa2   : > { %417 = vst.msk [vmem:[#allocation2 + $0x40] sm:$0xff] %vm295_vm0, %v386_v28  ;;  %v365_v30 = vadd.f32 %v1034_v24, %v364_v29 }
  0xa3   : > { %v425_v31 = vld [vmem:[#allocation2] sm:$0xff] }
  0xa4   : > { %410 = vst.msk [vmem:[#allocation2 + $0x8] sm:$0xff] %vm295_vm0, %v365_v30  ;;  %721 = vmatmul.msk.f32.vlgmr.msra.gmra.mxu1 %vm295_vm0, %v425_v31 }
  0xa7   : > { %v388_v32 = vpop.f32.mrf.mxu2 }
  0xa8   : > { %v389_v33 = vadd.f32 %v1034_v24, %v388_v32 }
  0xa9   : > { %v433_v34 = vld [vmem:[#allocation2 + $0x40] sm:$0xff]  ;;  %v367_v35 = vpop.f32.mrf.mxu0 }
  0xaa   : > { %418 = vst.msk [vmem:[#allocation2 + $0x48] sm:$0xff] %vm295_vm0, %v389_v33  ;;  %729 = vmatmul.msk.f32.vlgmr.msra.gmra.mxu3 %vm295_vm0, %v433_v34  ;;  %v368_v36 = vadd.f32 %v1034_v24, %v367_v35 }
  0xab   : > { %v426_v37 = vld [vmem:[#allocation2 + $0x8] sm:$0xff] }
  0xac   : > { %411 = vst.msk [vmem:[#allocation2 + $0x10] sm:$0xff] %vm295_vm0, %v368_v36  ;;  %722 = vmatmul.msk.f32.gmra.mxu1 %vm295_vm0, %v426_v37 }
  0xaf   : > { %v391_v38 = vpop.f32.mrf.mxu2 }
  0xb0   : > { %v392_v39 = vadd.f32 %v1034_v24, %v391_v38 }
  0xb1   : > { %v434_v40 = vld [vmem:[#allocation2 + $0x48] sm:$0xff]  ;;  %v370_v41 = vpop.f32.mrf.mxu0 }
  0xb2   : > { %419 = vst.msk [vmem:[#allocation2 + $0x50] sm:$0xff] %vm295_vm0, %v392_v39  ;;  %730 = vmatmul.msk.f32.gmra.mxu3 %vm295_vm0, %v434_v40  ;;  %v371_v42 = vadd.f32 %v1034_v24, %v370_v41 }
  0xb3   : > { %v427_v43 = vld [vmem:[#allocation2 + $0x10] sm:$0xff] }
  0xb4   : > { %412 = vst.msk [vmem:[#allocation2 + $0x18] sm:$0xff] %vm295_vm0, %v371_v42  ;;  %723 = vmatmul.msk.f32.gmra.mxu1 %vm295_vm0, %v427_v43 }
  0xb7   : > { %v394_v44 = vpop.f32.mrf.mxu2 }
  0xb8   : > { %v395_v45 = vadd.f32 %v1034_v24, %v394_v44 }
  0xb9   : > { %v435_v46 = vld [vmem:[#allocation2 + $0x50] sm:$0xff]  ;;  %v373_v47 = vpop.f32.mrf.mxu0 }
  0xba   : > { %420 = vst.msk [vmem:[#allocation2 + $0x58] sm:$0xff] %vm295_vm0, %v395_v45  ;;  %731 = vmatmul.msk.f32.gmra.mxu3 %vm295_vm0, %v435_v46  ;;  %v374_v48 = vadd.f32 %v1034_v24, %v373_v47 }
  0xbb   : > { %v428_v49 = vld [vmem:[#allocation2 + $0x18] sm:$0xff] }
  0xbc   : > { %413 = vst.msk [vmem:[#allocation2 + $0x20] sm:$0xff] %vm295_vm0, %v374_v48  ;;  %724 = vmatmul.msk.f32.gmra.mxu1 %vm295_vm0, %v428_v49 }
  0xbf   : > { %v397_v50 = vpop.f32.mrf.mxu2 }
  0xc0   : > { %v398_v51 = vadd.f32 %v1034_v24, %v397_v50 }
  0xc1   : > { %v436_v52 = vld [vmem:[#allocation2 + $0x58] sm:$0xff]  ;;  %v376_v53 = vpop.f32.mrf.mxu0 }
  0xc2   : > { %421 = vst.msk [vmem:[#allocation2 + $0x60] sm:$0xff] %vm295_vm0, %v398_v51  ;;  %732 = vmatmul.msk.f32.gmra.mxu3 %vm295_vm0, %v436_v52  ;;  %v377_v54 = vadd.f32 %v1034_v24, %v376_v53 }
  0xc3   : > { %v429_v55 = vld [vmem:[#allocation2 + $0x20] sm:$0xff] }
  0xc4   : > { %414 = vst.msk [vmem:[#allocation2 + $0x28] sm:$0xff] %vm295_vm0, %v377_v54  ;;  %725 = vmatmul.msk.f32.gmra.mxu1 %vm295_vm0, %v429_v55 }
  0xc7   : > { %v400_v56 = vpop.f32.mrf.mxu2 }
  0xc8   : > { %v401_v57 = vadd.f32 %v1034_v24, %v400_v56 }
  0xc9   : > { %v437_v58 = vld [vmem:[#allocation2 + $0x60] sm:$0xff]  ;;  %v379_v59 = vpop.f32.mrf.mxu0 }
  0xca   : > { %422 = vst.msk [vmem:[#allocation2 + $0x68] sm:$0xff] %vm295_vm0, %v401_v57  ;;  %733 = vmatmul.msk.f32.gmra.mxu3 %vm295_vm0, %v437_v58  ;;  %v380_v60 = vadd.f32 %v1034_v24, %v379_v59 }
  0xcb   : > { %v430_v61 = vld [vmem:[#allocation2 + $0x28] sm:$0xff] }
  0xcc   : > { %415 = vst.msk [vmem:[#allocation2 + $0x30] sm:$0xff] %vm295_vm0, %v380_v60  ;;  %726 = vmatmul.msk.f32.gmra.mxu1 %vm295_vm0, %v430_v61 }
  0xcf   : > { %v403_v62 = vpop.f32.mrf.mxu2 }
  0xd0   : > { %v404_v63 = vadd.f32 %v1034_v24, %v403_v62 }
  0xd1   : > { %v438_v0 = vld [vmem:[#allocation2 + $0x68] sm:$0xff]  ;;  %v382_v1 = vpop.f32.mrf.mxu0 }
  0xd2   : > { %423 = vst.msk [vmem:[#allocation2 + $0x70] sm:$0xff] %vm295_vm0, %v404_v63  ;;  %734 = vmatmul.msk.f32.gmra.mxu3 %vm295_vm0, %v438_v0  ;;  %v383_v2 = vadd.f32 %v1034_v24, %v382_v1 }
  0xd3   : > { %v431_v3 = vld [vmem:[#allocation2 + $0x30] sm:$0xff] }
  0xd4   : > { %416 = vst.msk [vmem:[#allocation2 + $0x38] sm:$0xff] %vm295_vm0, %v383_v2  ;;  %727 = vmatmul.msk.f32.gmra.mxu1 %vm295_vm0, %v431_v3 }
  0xd7   : > { %v406_v4 = vpop.f32.mrf.mxu2 }
  0xd8   : > { %v407_v5 = vadd.f32 %v1034_v24, %v406_v4 }
  0xd9   : > { %v439_v6 = vld [vmem:[#allocation2 + $0x70] sm:$0xff] }
  0xda   : > { %424 = vst.msk [vmem:[#allocation2 + $0x78] sm:$0xff] %vm295_vm0, %v407_v5  ;;  %735 = vmatmul.msk.f32.gmra.mxu3 %vm295_vm0, %v439_v6 }
  0xdb   : > { %v432_v7 = vld [vmem:[#allocation2 + $0x38] sm:$0xff] }
  0xdc   : > { %728 = vmatmul.msk.f32.gmra.mxu1 %vm295_vm0, %v432_v7 }
  0xe1   : > { %v440_v8 = vld [vmem:[#allocation2 + $0x78] sm:$0xff] }
  0xe2   : > { %736 = vmatmul.msk.f32.gmra.mxu3 %vm295_vm0, %v440_v8 }
 0x121   : > { %v511_v9 = vpop.f32.mrf.mxu1 }
 0x122   : > { %559 = vst [vmem:[%s1087_s8] sm:$0xff] %v511_v9 }
 0x129   : > { %v514_v10 = vpop.f32.mrf.mxu1 }
 0x12a   : > { %560 = vst [vmem:[%s1087_s8 + $0x8] sm:$0xff] %v514_v10 }
 0x12d   : > { %v535_v11 = vpop.f32.mrf.mxu3 }
 0x12e   : > { %567 = vst [vmem:[%s1087_s8 + $0x40] sm:$0xff] %v535_v11 }
 0x131   : > { %v517_v12 = vpop.f32.mrf.mxu1 }
 0x132   : > { %561 = vst [vmem:[%s1087_s8 + $0x10] sm:$0xff] %v517_v12 }
 0x135   : > { %v538_v13 = vpop.f32.mrf.mxu3 }
 0x136   : > { %568 = vst [vmem:[%s1087_s8 + $0x48] sm:$0xff] %v538_v13 }
 0x139   : > { %v520_v14 = vpop.f32.mrf.mxu1 }
 0x13a   : > { %562 = vst [vmem:[%s1087_s8 + $0x18] sm:$0xff] %v520_v14 }
 0x13d   : > { %v541_v15 = vpop.f32.mrf.mxu3 }
 0x13e   : > { %569 = vst [vmem:[%s1087_s8 + $0x50] sm:$0xff] %v541_v15 }
 0x141   : > { %v523_v16 = vpop.f32.mrf.mxu1 }
 0x142   : > { %563 = vst [vmem:[%s1087_s8 + $0x20] sm:$0xff] %v523_v16 }
 0x145   : > { %v544_v17 = vpop.f32.mrf.mxu3 }
 0x146   : > { %570 = vst [vmem:[%s1087_s8 + $0x58] sm:$0xff] %v544_v17 }
 0x149   : > { %v526_v18 = vpop.f32.mrf.mxu1 }
 0x14a   : > { %564 = vst [vmem:[%s1087_s8 + $0x28] sm:$0xff] %v526_v18 }
 0x14d   : > { %v547_v19 = vpop.f32.mrf.mxu3 }
 0x14e   : > { %571 = vst [vmem:[%s1087_s8 + $0x60] sm:$0xff] %v547_v19 }
 0x151   : > { %v529_v20 = vpop.f32.mrf.mxu1 }
 0x152   : > { %565 = vst [vmem:[%s1087_s8 + $0x30] sm:$0xff] %v529_v20 }
 0x155   : > { %v550_v21 = vpop.f32.mrf.mxu3 }
 0x156   : > { %572 = vst [vmem:[%s1087_s8 + $0x68] sm:$0xff] %v550_v21 }
 0x159   : > { %v532_v22 = vpop.f32.mrf.mxu1 }
 0x15a   : > { %566 = vst [vmem:[%s1087_s8 + $0x38] sm:$0xff] %v532_v22 }
 0x15d   : > { %v553_v23 = vpop.f32.mrf.mxu3 }
 0x15e   : > { %573 = vst [vmem:[%s1087_s8 + $0x70] sm:$0xff] %v553_v23 }
 0x165   : > { %v556_v24 = vpop.f32.mrf.mxu3 }
 0x166   : > { %574 = vst [vmem:[%s1087_s8 + $0x78] sm:$0xff] %v556_v24 }
 0x167   : > { %838 = shalt.err (!%p835_p5)
}
 0x168   : > { %s891_s6 = smov 128   ;;  %s892_s7 = smov 8  }
 0x169   : > { %753 = dma.vmem_to_hbm [thread:$0]  (%p958_p4), %s592_s13, 2048, %s594_s14, %s576_s21, %s891_s6, %s891_s6, %s892_s7  }
 0x16a PF: > { %p759_p6 = scmp.ge.s32.totalorder %s889_s20, 2  ;;  %s608_s8 = sand.u32 1, %s869_s15  }
 0x16b   : > { %s609_s9 = scalar_lea.sflag [#allocation4], %s608_s8 }
 0x16c   : > { %p756_p7 = pnand %p759_p6, %p965_p8 }
 0x16e   : > { %p757_p9 = pneg %p756_p7 }
 0x170   : > { %864 = dma.done.wait (%p757_p9), %s609_s9, 2048  }
 0x171   : > { %866 = vsyncadd (%p757_p9), %s609_s9, 4294965248  ;;  %s17_s20 = sadd.s32 1, %s889_s20   ;;  %s1151_s15 = smov %s873_s16 }
 0x172   : > { %p14_p10 = scmp.ge.s32.totalorder %s17_s20, 4   ;;  %s1152_s16 = smov %s877_s17 }
 0x173   : > { %s1153_s17 = smov %s971_s28  ;;  %s1154_s18 = smov %s885_s19 }
 0x174   : > { %s1155_s19 = smov %s1157_s23  ;;  %16 = sbr.rel (!%p14_p10) target bundleno = 4 (0x4), region = 78 }
 0x179   :  { %615 = vsyncpa [#allocation4], 1 }
 0x17a   :  { %617 = vsyncpa [#allocation4 + $0x1], 1 }

</bundles_post_ra>
